<compile_context>
chip_gen: v5e
topology: v5e:2x2
jax: 0.10.0
libtpu: 0.0.40
codegen_flags: <defaults>
</compile_context>

<pallas_src>
import functools

import jax
import jax.numpy as jnp
import numpy as np
from jax.experimental import pallas as pl
from jax.experimental.pallas import tpu as pltpu

COV_MIN = 1e-4
MEAN_CLAMP_MIN, MEAN_CLAMP_MAX = -5.0, 5.0
COV_CLAMP_MIN, COV_CLAMP_MAX = -5.0, 20.0

_LANE = 128
_SUBLANE = 8


def _round_up(x, m):
    return (x + m - 1) // m * m


# --------------------------------------------------------------------------
# Kernel
# --------------------------------------------------------------------------
def _actor_kernel(state_ref, w_ref, rows_ref, out_ref, *,
                  obs_dim, h1, h2, r_w1, r_w2, r_wh):
    """Whole actor forward for the full batch in one invocation.

    state_ref : [B, obs_dim]
    w_ref     : [r_wh + h2_pad, NL] sublane-stacked weights:
                  rows [r_w1 : r_w1+obs_dim], lanes [0:h1]  -> w1
                  rows [r_w2 : r_w2+h1],      lanes [0:h2]  -> w2
                  rows [r_wh : r_wh+h2],      lanes [0:NL]  -> fused head [wm | wc@scat | 0]
    rows_ref  : [8, NL] row constants:
                  0: b1 (lanes 0:h1)        1: b2 (lanes 0:h2)
                  2: fused head bias [bm | bc@scat | 0]
                  3: action_low (lanes 0:A) 4: action_high-action_low (lanes 0:A)
                  5: mean-column mask       6: cholesky-diagonal-column mask
    out_ref   : [B, NL] lane-dense: [mean | cholesky_flat(A*A) | pad]
    """
    x = state_ref[...]

    w1 = w_ref[r_w1:r_w1 + obs_dim, 0:h1]
    w2 = w_ref[r_w2:r_w2 + h1, 0:h2]
    wh = w_ref[r_wh:r_wh + h2, :]

    b1 = rows_ref[0:1, 0:h1]
    b2 = rows_ref[1:2, 0:h2]
    bh = rows_ref[2:3, :]
    alow = rows_ref[3:4, :]
    arange = rows_ref[4:5, :]
    mean_mask = rows_ref[5:6, :]
    diag_mask = rows_ref[6:7, :]

    # Trunk MLP (output_activation == activation == ReLU).
    h = jnp.maximum(jnp.dot(x, w1, preferred_element_type=jnp.float32) + b1, 0.0)
    h = jnp.maximum(jnp.dot(h, w2, preferred_element_type=jnp.float32) + b2, 0.0)

    # Fused head: one lane-dense matmul -> [mean | scattered cholesky | pad].
    z = jnp.dot(h, wh, preferred_element_type=jnp.float32) + bh

    # Mean path: clamp -> sigmoid -> rescale to [action_low, action_high].
    m = jnp.clip(z, MEAN_CLAMP_MIN, MEAN_CLAMP_MAX)
    m = 1.0 / (1.0 + jnp.exp(-m))
    m = alow + arange * m

    # Cholesky path: clamp (clamp(0)=0 keeps strictly-upper zeros), softplus(+eps)
    # on diagonal lanes only.  z <= 20 after clamp -> log1p(exp) is exact/stable.
    c = jnp.clip(z, COV_CLAMP_MIN, COV_CLAMP_MAX)
    c = jnp.where(diag_mask > 0.5, jnp.log1p(jnp.exp(c)) + COV_MIN, c)

    out_ref[...] = jnp.where(mean_mask > 0.5, m, c).astype(out_ref.dtype)


# --------------------------------------------------------------------------
# Host-side packing: fold scatter into head weights, stack inputs densely.
# --------------------------------------------------------------------------
def pack_actor_params(params, obs_dim, act_dim, hidden_sizes):
    w1, b1, w2, b2, wm, bm, wc, bc, alow, arange = params
    h1, h2 = hidden_sizes
    A = act_dim

    n_lanes = _round_up(max(h1, h2, A + A * A, _LANE), _LANE)

    # Row-major tril order (matches torch.tril_indices with offset=0).
    tril = [(i, j) for i in range(A) for j in range(i + 1)]
    scat = np.zeros((len(tril), A * A), np.float32)
    for t, (i, j) in enumerate(tril):
        scat[t, i * A + j] = 1.0
    wc_scat = np.asarray(wc, np.float32) @ scat           # [h2, A*A] (exact: 1 nonzero/row)
    bc_scat = np.asarray(bc, np.float32).reshape(1, -1) @ scat

    r_w1 = 0
    r_w2 = _round_up(obs_dim, _SUBLANE)
    r_wh = r_w2 + _round_up(h1, _SUBLANE)
    n_rows = r_wh + _round_up(h2, _SUBLANE)

    w_stack = np.zeros((n_rows, n_lanes), np.float32)
    w_stack[r_w1:r_w1 + obs_dim, :h1] = np.asarray(w1, np.float32)
    w_stack[r_w2:r_w2 + h1, :h2] = np.asarray(w2, np.float32)
    w_stack[r_wh:r_wh + h2, :A] = np.asarray(wm, np.float32)
    w_stack[r_wh:r_wh + h2, A:A + A * A] = wc_scat

    rows = np.zeros((_SUBLANE, n_lanes), np.float32)
    rows[0, :h1] = np.asarray(b1, np.float32).reshape(-1)
    rows[1, :h2] = np.asarray(b2, np.float32).reshape(-1)
    rows[2, :A] = np.asarray(bm, np.float32).reshape(-1)
    rows[2, A:A + A * A] = bc_scat.reshape(-1)
    rows[3, :A] = np.asarray(alow, np.float32).reshape(-1)
    rows[4, :A] = np.asarray(arange, np.float32).reshape(-1)
    rows[5, :A] = 1.0                                      # mean-column mask
    for i in range(A):                                     # diag-column mask (offset by A)
        rows[6, A + i * A + i] = 1.0

    meta = dict(obs_dim=obs_dim, act_dim=A, h1=h1, h2=h2,
                r_w1=r_w1, r_w2=r_w2, r_wh=r_wh, n_lanes=n_lanes)
    return jnp.asarray(w_stack), jnp.asarray(rows), meta


def cholesky_gaussian_actor_forward(state, w_stack, row_consts, meta):
    """Returns (mean [B, A], cholesky [B, A, A]) — same as the nn.Module."""
    B = state.shape[0]
    A = meta["act_dim"]
    n_lanes = meta["n_lanes"]

    kernel = functools.partial(
        _actor_kernel,
        obs_dim=meta["obs_dim"], h1=meta["h1"], h2=meta["h2"],
        r_w1=meta["r_w1"], r_w2=meta["r_w2"], r_wh=meta["r_wh"])

    vmem = pltpu.MemorySpace.VMEM
    # Grid-less single invocation: at small B the whole forward is far below one
    # MXU pass, so any grid would only add per-step overhead.  For large B, add
    # a batch grid axis with dimension_semantics=("parallel",) to use both v7x TCs.
    out = pl.pallas_call(
        kernel,
        out_shape=jax.ShapeDtypeStruct((B, n_lanes), jnp.float32),
        in_specs=[pl.BlockSpec(memory_space=vmem)] * 3,
        out_specs=pl.BlockSpec(memory_space=vmem),
    )(state, w_stack, row_consts)

    mean = out[:, :A]
    chol = out[:, A:A + A * A].reshape(B, A, A)
    return mean, chol


# --------------------------------------------------------------------------
# Parameter init (matches the module: xavier-normal weights, zero biases)
# --------------------------------------------------------------------------
def init_params(key, obs_dim, act_dim, hidden_sizes, action_low, action_high):
    h1, h2 = hidden_sizes
    tril_dim = act_dim * (act_dim + 1) // 2

    def xavier(k, fan_in, fan_out):
        std = (2.0 / (fan_in + fan_out)) ** 0.5
        return std * jax.random.normal(k, (fan_in, fan_out), dtype=jnp.float32)

    k1, k2, k3, k4 = jax.random.split(key, 4)
    w1 = xavier(k1, obs_dim, h1)
    w2 = xavier(k2, h1, h2)
    wm = xavier(k3, h2, act_dim)
    wc = xavier(k4, h2, tril_dim)
    b1 = jnp.zeros((1, h1), jnp.float32)
    b2 = jnp.zeros((1, h2), jnp.float32)
    bm = jnp.zeros((1, act_dim), jnp.float32)
    bc = jnp.zeros((1, tril_dim), jnp.float32)
    alow = jnp.asarray(action_low, jnp.float32).reshape(1, act_dim)
    arange = (jnp.asarray(action_high, jnp.float32)
              - jnp.asarray(action_low, jnp.float32)).reshape(1, act_dim)
    return (w1, b1, w2, b2, wm, bm, wc, bc, alow, arange)


# --------------------------------------------------------------------------
# Pure-JAX reference mirroring the PyTorch forward (unfused params)
# --------------------------------------------------------------------------
def _tril_index_arrays(act_dim):
    tril = [(i, j) for i in range(act_dim) for j in range(i + 1)]
    rows = jnp.array([i for i, _ in tril], jnp.int32)
    cols = jnp.array([j for _, j in tril], jnp.int32)
    diag = jnp.array([t for t, (i, j) in enumerate(tril) if i == j], jnp.int32)
    return rows, cols, diag


def _reference_forward(state, params, act_dim, tril_rows, tril_cols, diag_pos):
    w1, b1, w2, b2, wm, bm, wc, bc, alow, arange = params
    hi = jax.lax.Precision.HIGHEST
    h = jnp.maximum(jnp.dot(state, w1, precision=hi) + b1, 0.0)
    h = jnp.maximum(jnp.dot(h, w2, precision=hi) + b2, 0.0)

    mean = jax.nn.sigmoid(jnp.clip(jnp.dot(h, wm, precision=hi) + bm,
                                   MEAN_CLAMP_MIN, MEAN_CLAMP_MAX))
    mean = alow + arange * mean

    cv = jnp.clip(jnp.dot(h, wc, precision=hi) + bc, COV_CLAMP_MIN, COV_CLAMP_MAX)
    cv = cv.at[:, diag_pos].set(jax.nn.softplus(cv[:, diag_pos]) + COV_MIN)

    B = state.shape[0]
    chol = jnp.zeros((B, act_dim, act_dim), jnp.float32)
    chol = chol.at[:, tril_rows, tril_cols].set(cv)
    return mean, chol


# --------------------------------------------------------------------------
if __name__ == "__main__":
    obs_dim, act_dim = 24, 8
    hidden_sizes = (32, 32)
    B = 8

    key = jax.random.PRNGKey(0)
    k_state, k_par = jax.random.split(key)
    state = jax.random.normal(k_state, (B, obs_dim), dtype=jnp.float32)

    action_low = -1.0 * jnp.ones((act_dim,), jnp.float32)
    action_high = 1.0 * jnp.ones((act_dim,), jnp.float32)

    params = init_params(k_par, obs_dim, act_dim, hidden_sizes, action_low, action_high)
    w_stack, row_consts, meta = pack_actor_params(params, obs_dim, act_dim, hidden_sizes)

    mean, chol = cholesky_gaussian_actor_forward(state, w_stack, row_consts, meta)
    mean = jax.block_until_ready(mean)
    chol = jax.block_until_ready(chol)

    tril_rows, tril_cols, diag_pos = _tril_index_arrays(act_dim)
    mean_ref, chol_ref = _reference_forward(state, params, act_dim,
                                            tril_rows, tril_cols, diag_pos)

    assert mean.shape == (B, act_dim)
    assert chol.shape == (B, act_dim, act_dim)
    assert jnp.allclose(mean, mean_ref, atol=1e-4, rtol=1e-4)
    assert jnp.allclose(chol, chol_ref, atol=1e-4, rtol=1e-4)

    print("KERNEL_OK")
</pallas_src>

<mosaic_0001>
module attributes {stable_mosaic.version = 11 : i64} {
  func.func @_actor_kernel(%arg0: memref<8x24xf32, #tpu.memory_space<vmem>>, %arg1: memref<88x128xf32, #tpu.memory_space<vmem>>, %arg2: memref<8x128xf32, #tpu.memory_space<vmem>>, %arg3: memref<8x128xf32, #tpu.memory_space<vmem>>) attributes {dimension_semantics = [], scalar_prefetch = 0 : i64, scratch_operands = 0 : i64, tpu.core_type = #tpu.core_type<tc>} {
    %c0 = arith.constant 0 : index
    %c0_0 = arith.constant 0 : index
    %0 = vector.load %arg0[%c0, %c0_0] : memref<8x24xf32, #tpu.memory_space<vmem>>, vector<8x24xf32>
    %c0_1 = arith.constant 0 : index
    %c0_2 = arith.constant 0 : index
    %1 = vector.load %arg1[%c0_1, %c0_2] : memref<88x128xf32, #tpu.memory_space<vmem>>, vector<24x32xf32>
    %c24 = arith.constant 24 : index
    %c0_3 = arith.constant 0 : index
    %2 = vector.load %arg1[%c24, %c0_3] : memref<88x128xf32, #tpu.memory_space<vmem>>, vector<32x32xf32>
    %c56 = arith.constant 56 : index
    %c0_4 = arith.constant 0 : index
    %3 = vector.load %arg1[%c56, %c0_4] : memref<88x128xf32, #tpu.memory_space<vmem>>, vector<32x128xf32>
    %c0_5 = arith.constant 0 : index
    %c0_6 = arith.constant 0 : index
    %4 = vector.load %arg2[%c0_5, %c0_6] : memref<8x128xf32, #tpu.memory_space<vmem>>, vector<1x32xf32>
    %c1 = arith.constant 1 : index
    %c0_7 = arith.constant 0 : index
    %5 = vector.load %arg2[%c1, %c0_7] : memref<8x128xf32, #tpu.memory_space<vmem>>, vector<1x32xf32>
    %c2 = arith.constant 2 : index
    %c0_8 = arith.constant 0 : index
    %6 = vector.load %arg2[%c2, %c0_8] : memref<8x128xf32, #tpu.memory_space<vmem>>, vector<1x128xf32>
    %c3 = arith.constant 3 : index
    %c0_9 = arith.constant 0 : index
    %7 = vector.load %arg2[%c3, %c0_9] : memref<8x128xf32, #tpu.memory_space<vmem>>, vector<1x128xf32>
    %c4 = arith.constant 4 : index
    %c0_10 = arith.constant 0 : index
    %8 = vector.load %arg2[%c4, %c0_10] : memref<8x128xf32, #tpu.memory_space<vmem>>, vector<1x128xf32>
    %c5 = arith.constant 5 : index
    %c0_11 = arith.constant 0 : index
    %9 = vector.load %arg2[%c5, %c0_11] : memref<8x128xf32, #tpu.memory_space<vmem>>, vector<1x128xf32>
    %c6 = arith.constant 6 : index
    %c0_12 = arith.constant 0 : index
    %10 = vector.load %arg2[%c6, %c0_12] : memref<8x128xf32, #tpu.memory_space<vmem>>, vector<1x128xf32>
    %cst = arith.constant dense<0.000000e+00> : vector<8x32xf32>
    %11 = tpu.matmul %0, %1, %cst {dimension_numbers = #tpu.dot_dimension_numbers<[1], [0], [0], [1], [0, 0, 1, 1], [], []>} : vector<8x24xf32>, vector<24x32xf32>, vector<8x32xf32> -> vector<8x32xf32>
    %12 = vector.broadcast %4 : vector<1x32xf32> to vector<8x32xf32>
    %13 = arith.addf %11, %12 : vector<8x32xf32>
    %cst_13 = arith.constant 0.000000e+00 : f32
    %14 = vector.broadcast %cst_13 : f32 to vector<8x32xf32>
    %15 = arith.maximumf %13, %14 : vector<8x32xf32>
    %cst_14 = arith.constant dense<0.000000e+00> : vector<8x32xf32>
    %16 = tpu.matmul %15, %2, %cst_14 {dimension_numbers = #tpu.dot_dimension_numbers<[1], [0], [0], [1], [0, 0, 1, 1], [], []>} : vector<8x32xf32>, vector<32x32xf32>, vector<8x32xf32> -> vector<8x32xf32>
    %17 = vector.broadcast %5 : vector<1x32xf32> to vector<8x32xf32>
    %18 = arith.addf %16, %17 : vector<8x32xf32>
    %cst_15 = arith.constant 0.000000e+00 : f32
    %19 = vector.broadcast %cst_15 : f32 to vector<8x32xf32>
    %20 = arith.maximumf %18, %19 : vector<8x32xf32>
    %cst_16 = arith.constant dense<0.000000e+00> : vector<8x128xf32>
    %21 = tpu.matmul %20, %3, %cst_16 {dimension_numbers = #tpu.dot_dimension_numbers<[1], [0], [0], [1], [0, 0, 1, 1], [], []>} : vector<8x32xf32>, vector<32x128xf32>, vector<8x128xf32> -> vector<8x128xf32>
    %22 = vector.broadcast %6 : vector<1x128xf32> to vector<8x128xf32>
    %23 = arith.addf %21, %22 : vector<8x128xf32>
    %cst_17 = arith.constant -5.000000e+00 : f32
    %cst_18 = arith.constant 5.000000e+00 : f32
    %24 = vector.broadcast %cst_17 : f32 to vector<8x128xf32>
    %25 = arith.maximumf %24, %23 : vector<8x128xf32>
    %26 = vector.broadcast %cst_18 : f32 to vector<8x128xf32>
    %27 = arith.minimumf %26, %25 : vector<8x128xf32>
    %cst_19 = arith.constant 0.000000e+00 : f32
    %28 = vector.broadcast %cst_19 : f32 to vector<8x128xf32>
    %29 = arith.subf %28, %27 : vector<8x128xf32>
    %30 = math.exp %29 : vector<8x128xf32>
    %cst_20 = arith.constant 1.000000e+00 : f32
    %31 = vector.broadcast %cst_20 : f32 to vector<8x128xf32>
    %32 = arith.addf %31, %30 : vector<8x128xf32>
    %cst_21 = arith.constant 1.000000e+00 : f32
    %33 = vector.broadcast %cst_21 : f32 to vector<8x128xf32>
    %34 = arith.divf %33, %32 : vector<8x128xf32>
    %35 = vector.broadcast %8 : vector<1x128xf32> to vector<8x128xf32>
    %36 = arith.mulf %35, %34 : vector<8x128xf32>
    %37 = vector.broadcast %7 : vector<1x128xf32> to vector<8x128xf32>
    %38 = arith.addf %37, %36 : vector<8x128xf32>
    %cst_22 = arith.constant -5.000000e+00 : f32
    %cst_23 = arith.constant 2.000000e+01 : f32
    %39 = vector.broadcast %cst_22 : f32 to vector<8x128xf32>
    %40 = arith.maximumf %39, %23 : vector<8x128xf32>
    %41 = vector.broadcast %cst_23 : f32 to vector<8x128xf32>
    %42 = arith.minimumf %41, %40 : vector<8x128xf32>
    %cst_24 = arith.constant 5.000000e-01 : f32
    %43 = vector.broadcast %cst_24 : f32 to vector<1x128xf32>
    %44 = arith.cmpf ogt, %10, %43 : vector<1x128xf32>
    %45 = math.exp %42 : vector<8x128xf32>
    %46 = math.log1p %45 : vector<8x128xf32>
    %cst_25 = arith.constant 9.99999974E-5 : f32
    %47 = vector.broadcast %cst_25 : f32 to vector<8x128xf32>
    %48 = arith.addf %46, %47 : vector<8x128xf32>
    %49 = vector.shape_cast %44 : vector<1x128xi1> to vector<1x128xi1>
    %50 = vector.broadcast %49 : vector<1x128xi1> to vector<8x128xi1>
    %51 = arith.select %50, %48, %42 : vector<8x128xi1>, vector<8x128xf32>
    %cst_26 = arith.constant 5.000000e-01 : f32
    %52 = vector.broadcast %cst_26 : f32 to vector<1x128xf32>
    %53 = arith.cmpf ogt, %9, %52 : vector<1x128xf32>
    %54 = vector.shape_cast %53 : vector<1x128xi1> to vector<1x128xi1>
    %55 = vector.broadcast %54 : vector<1x128xi1> to vector<8x128xi1>
    %56 = arith.select %55, %38, %51 : vector<8x128xi1>, vector<8x128xf32>
    %c0_27 = arith.constant 0 : index
    %c0_28 = arith.constant 0 : index
    %57 = vector.load %arg3[%c0_27, %c0_28] : memref<8x128xf32, #tpu.memory_space<vmem>>, vector<8x128xf32>
    tpu.vector_store %arg3[%c0_27, %c0_28], %56 {strides = array<i32>} : memref<8x128xf32, #tpu.memory_space<vmem>>, vector<8x128xf32>,
    return
  }
}

</mosaic_0001>

<bundles_post_ra>
// kernel: tpu_custom_call.1
= control target key start
LH: loop header
LB: loop body
LE: loop exit
PB: predicated region body
PF: predicated region fallthrough
CT: control target
= control target key end

     0   :  { %8 = vsyncpa [#allocation3], 0  ;;  %s385_s0 = inlined_call_operand.hbm [shape: f32[8,24], index: 0, kind: input, shape index: {}]   ;;  %s386_s1 = inlined_call_operand.hbm [shape: f32[88,128], index: 1, kind: input, shape index: {}]   ;;  %s387_s2 = inlined_call_operand.hbm [shape: f32[8,128], index: 2, kind: input, shape index: {}]   ;;  %s388_s3 = inlined_call_operand.hbm [shape: f32[8,128], index: 3, kind: output, shape index: {}]  }
   0x1   :  { %9 = vsyncpa [#allocation6], 0  ;;  %s26_s14 = sshll.u32 %s386_s1, 4  ;;  %s27_s14 = int_to_ptr.hbm [resolvable:$true] %s26_s14 }
   0x2   :  { %10 = vsyncpa [#allocation4], 0  ;;  %s346_s15 = smov [#allocation5]   ;;  %s16_s19 = sshll.u32 %s385_s0, 4  ;;  %s17_s19 = int_to_ptr.hbm [resolvable:$true] %s16_s19 }
   0x3   :  { %s28_s16 = sshll.u32 %s346_s15, 4  ;;  %s347_s20 = smov 128   ;;  %s29_s16 = int_to_ptr.vmem [resolvable:$true] %s28_s16 }
   0x4   :  { %s348_s21 = smov 8   ;;  %s349_s22 = smov [#allocation2]  }
   0x5   :  { %34 = dma.hbm_to_vmem [thread:$0]  %s27_s14, 1408, %s29_s16, [#allocation6], %s347_s20, %s347_s20, %s348_s21  }
   0x6   :  { %s18_s23 = sshll.u32 %s349_s22, 4  ;;  %s40_s26 = sshll.u32 %s387_s2, 4  ;;  %s19_s23 = int_to_ptr.vmem [resolvable:$true] %s18_s23  ;;  %s41_s26 = int_to_ptr.hbm [resolvable:$true] %s40_s26 }
   0x7   :  { %21 = dma.hbm_to_vmem [thread:$0]  %s17_s19, 128, %s19_s23, [#allocation3]  }
   0x8   :  { %s350_s1 = smov [#allocation7]  }
   0x9   :  { %s42_s27 = sshll.u32 %s350_s1, 4  ;;  %s43_s27 = int_to_ptr.vmem [resolvable:$true] %s42_s27 }
   0xa   :  { %45 = dma.hbm_to_vmem [thread:$0]  %s41_s26, 128, %s43_s27, [#allocation6]  }
   0xb   :  { %340 = dma.done.wait [#allocation3], 128  }
   0xc   :  { %341 = vsyncadd [#allocation3], 4294967168 }
   0xd   :  { %342 = dma.done.wait [#allocation6], 1536  }
   0xe   :  { %343 = vsyncadd [#allocation6], 4294965760  ;;  %v61_v0 = vld [vmem:[#allocation5 + $0x10] sm:$0xff]  ;;  %v60_v1 = vld [vmem:[#allocation5 + $0x8] sm:$0xff]  ;;  %vm78_vm0 = vcmask 195584   ;;  %vm104_vm1 = vcmask 261120  }
   0xf   :  { %95 = vmatpush.msra.mxu0 %v61_v0  ;;  %v65_v2 = vld [vmem:[#allocation5 + $0x30] sm:$0xff]  ;;  %v59_v3 = vld [vmem:[#allocation5] sm:$0xff]  ;;  %v58_v4 = vld [vmem:[#allocation2] sm:$0xff]  ;;  %v351_v44 = vmov 0   ;;  %s352_s0 = smov [#allocation8]   ;;  %s209_s30 = sshll.u32 %s388_s3, 4  ;;  %s210_s30 = int_to_ptr.hbm [resolvable:$true] %s209_s30 }
  0x10   :  { %120 = vmatpush.msra.mxu1 %v65_v2  ;;  %v64_v5 = vld [vmem:[#allocation5 + $0x28] sm:$0xff]  ;;  %v63_v6 = vld [vmem:[#allocation5 + $0x20] sm:$0xff]  ;;  %v62_v7 = vld [vmem:[#allocation5 + $0x18] sm:$0xff]  ;;  %s207_s2 = sshll.u32 %s352_s0, 4  ;;  %s208_s2 = int_to_ptr.vmem [resolvable:$true] %s207_s2 }
  0x11   :  { %96 = vmatpush.msra.mxu0 %v60_v1  ;;  %v69_v8 = vld [vmem:[#allocation5 + $0x50] sm:$0xff]  ;;  %v231_v9 = vld [vmem:[#allocation7] ss:$0 sm:$0xff]  ;;  %v68_v13 = vld [vmem:[#allocation5 + $0x48] sm:$0xff] }
  0x12   :  { %121 = vmatpush.msra.mxu1 %v64_v5  ;;  %145 = vmatpush.msra.mxu2 %v69_v8  ;;  %v67_v14 = vld [vmem:[#allocation5 + $0x40] sm:$0xff]  ;;  %v66_v15 = vld [vmem:[#allocation5 + $0x38] sm:$0xff] }
  0x13   :  { %97 = vmatpush.msra.mxu0 %v59_v3  ;;  %v232_v16 = vld [vmem:[#allocation7 + $0x1] ss:$0 sm:$0xff]  ;;  %v233_v20 = vld [vmem:[#allocation7 + $0x2] ss:$0 sm:$0xff]  ;;  %v76_v33 = vld [vmem:[#allocation7 + $0x6] sm:$0x1] }
  0x14   :  { %220 = vmatmul.msk.f32.vlgmr.msra.gmra.mxu0 %vm78_vm0, %v58_v4  ;;  %122 = vmatpush.msra.mxu1 %v63_v6  ;;  %v75_v35 = vld [vmem:[#allocation7 + $0x5] sm:$0x1]  ;;  %vm179_vm2 = vcmp.gt.f32.partialorder %v76_v33, 0.5  ;;  %v234_v51 = vld [vmem:[#allocation7 + $0x4] ss:$0 sm:$0xff] }
  0x15   :  { %146 = vmatpush.msra.mxu2 %v68_v13  ;;  %vm196_vm3 = vcmp.gt.f32.partialorder %v75_v35, 0.5  ;;  %v192_v45 = vsel %vm179_vm2, 1, %v351_v44  ;;  %v235_v57 = vld [vmem:[#allocation7 + $0x3] ss:$0 sm:$0xff] }
  0x16   :  { %123 = vmatpush.msra.mxu1 %v62_v7  ;;  %v197_v46 = vsel %vm196_vm3, 1, %v351_v44  ;;  %v193_v53 = vperm.slane %v192_v45, 0 }
  0x17   :  { %147 = vmatpush.msra.mxu2 %v67_v14  ;;  %v198_v55 = vperm.slane %v197_v46, 0 }
  0x18   :  { %vm194_vm9 = vcmp.eq.s32.totalorder %v193_v53, 1 }
  0x19   :  { %148 = vmatpush.msra.mxu2 %v66_v15  ;;  %vm199_vm10 = vcmp.eq.s32.totalorder %v198_v55, 1 }
  0x91   :  { %v99_v10 = vpop.f32.mrf.mxu0 }
  0x92   :  { %v100_v11 = vadd.f32 %v231_v9, %v99_v10 }
  0x94   :  { %v102_v12 = vmax.f32 %v100_v11, 0.0 }
  0x96   :  { %221 = vmatmul.msk.f32.vlgmr.msra.gmra.mxu1 %vm104_vm1, %v102_v12 }
 0x113   :  { %v125_v17 = vpop.f32.mrf.mxu1 }
 0x114   :  { %v126_v18 = vadd.f32 %v232_v16, %v125_v17 }
 0x116   :  { %v128_v19 = vmax.f32 %v126_v18, 0.0 }
 0x118   :  { %222 = vmatmul.msk.f32.vlgmr.msra.gmra.mxu2 %vm104_vm1, %v128_v19 }
 0x19b   :  { %v150_v21 = vpop.f32.mrf.mxu2 }
 0x19c   :  { %v151_v22 = vadd.f32 %v233_v20, %v150_v21 }
 0x19e   :  { %v153_v23 = vmax.f32 %v151_v22, -5.0  ;;  %v223_v24 = vclamps-f32 %v151_v22, 5.0 }
 0x1a0   :  { %v155_v25 = vsub.f32 0.0, %v223_v24  ;;  %v178_v26 = vmin.f32 %v153_v23, 20.0 }
 0x1a2   :  { %v156_v27 = vmul.f32 1.442695, %v155_v25  ;;  %v180_v28 = vmul.f32 1.442695, %v178_v26 }
 0x1a4   :  { %236 = vpow2.f32 %v156_v27 }
 0x1a5   :  { %238 = vpow2.f32 %v180_v28 }
 0x1aa   :  { %v237_v29 = vpop.eup %236 }
 0x1ab   :  { %v239_v30 = vpop.eup %238  ;;  %v158_v31 = vadd.f32 1.0, %v237_v29 }
 0x1ac   :  { %v182_v32 = vadd.f32 1.0, %v239_v30  ;;  %v185_v34 = vmul.f32 -0.5, %v239_v30  ;;  %v188_v40 = vand.u32 2147483647, %v239_v30 }
 0x1ad   :  { %240 = vrcp.f32 %v158_v31  ;;  %v170_v43 = vand.u32 2147483648, %v158_v31  ;;  %v168_v48 = vand.u32 2147483647, %v158_v31  ;;  %vm164_vm6 = vweird.f32 %v158_v31 }
 0x1ae   :  { %242 = vlog2.f32 %v182_v32  ;;  %v186_v39 = vadd.f32 1.0, %v185_v34  ;;  %vm189_vm5 = vcmp.lt.f32.partialorder %v188_v40, 0.0004427343 }
 0x1af   :  { %v171_v54 = vor.u32 1.1754944e-38, %v170_v43  ;;  %vm169_vm8 = vcmp.eq.f32.partialorder %v168_v48, 8.507059e+37 }
 0x1b0   :  { %v187_v49 = vmul.f32 %v239_v30, %v186_v39 }
 0x1b3   :  { %v241_v36 = vpop.eup %240 }
 0x1b4   :  { %v243_v37 = vpop.eup %242  ;;  %v160_v38 = vmul.f32 %v241_v36, %v158_v31  ;;  %vm165_vm4 = vweird.f32 %v241_v36 }
 0x1b5   :  { %v184_v42 = vmul.f32 0.6931472, %v243_v37  ;;  %vm166_vm7 = vmor %vm164_vm6, %vm165_vm4 }
 0x1b6   :  { %v161_v41 = vsub.f32 1.0, %v160_v38 }
 0x1b7   :  { %v190_v52 = vsel %vm189_vm5, %v187_v49, %v184_v42 }
 0x1b8   :  { %v162_v47 = vmul.f32 %v241_v36, %v161_v41  ;;  %v191_v59 = vadd.f32 0.0001, %v190_v52 }
 0x1ba   :  { %v163_v50 = vadd.f32 %v241_v36, %v162_v47  ;;  %v195_v62 = vsel %vm194_vm9, %v191_v59, %v178_v26 }
 0x1bc   :  { %v167_v56 = vsel %vm166_vm7, %v241_v36, %v163_v50 }
 0x1bd   :  { %v172_v58 = vsel %vm169_vm8, %v171_v54, %v167_v56 }
 0x1be   :  { %v175_v60 = vmul.f32 %v234_v51, %v172_v58 }
 0x1c0   :  { %v177_v61 = vadd.f32 %v235_v57, %v175_v60 }
 0x1c2   :  { %v200_v63 = vsel %vm199_vm10, %v177_v61, %v195_v62 }
 0x1c3   :  { %201 = vst [vmem:[#allocation8] sm:$0xff] %v200_v63 }
 0x1c4   :  { %212 = dma.vmem_to_hbm [thread:$0]  %s208_s2, 128, %s210_s30, [#allocation4]  }
 0x1c5   :  { %344 = dma.done.wait [#allocation4], 128  }
 0x1c6   :  { %345 = vsyncadd [#allocation4], 4294967168 }
 0x1c7   :  { %217 = vsyncpa [#allocation3], 1 }
 0x1c8   :  { %218 = vsyncpa [#allocation6], 1 }
 0x1c9   :  { %219 = vsyncpa [#allocation4], 1 }

</bundles_post_ra>
